<compile_context>
chip_gen: v6e
topology: v6e:2x2x1
jax: 0.10.0
libtpu: 0.0.40
codegen_flags: <defaults>
</compile_context>

<pallas_src>
import functools

import jax
import jax.numpy as jnp
from jax.experimental import pallas as pl
from jax.experimental.pallas import tpu as pltpu


# ----------------------------- Pallas kernels ------------------------------

def _make_reduce_kernel(num_layers, reduce_opt):
    """Build a kernel reducing `num_layers` (tm, C) input refs elementwise."""
    inv_l = 1.0 / float(num_layers)

    def kernel(*refs):
        in_refs = refs[:num_layers]
        o_ref = refs[num_layers]
        if reduce_opt == "mean":
            acc = in_refs[0][...].astype(jnp.float32)
            for r in in_refs[1:]:
                acc = acc + r[...].astype(jnp.float32)
            # scalar-broadcast multiply on the VPU instead of a per-element
            # divide through the EUP
            o_ref[...] = acc * jnp.float32(inv_l)
        else:  # "max"
            acc = in_refs[0][...]
            for r in in_refs[1:]:
                acc = jnp.maximum(acc, r[...])
            o_ref[...] = acc

    return kernel


def _lane_dense_view(total_elems, last_dim):
    """Pick a lane-dense (rows, cols) factorization of the element count."""
    for cols in (1024, 512, 256, 128):
        if total_elems % cols == 0:
            return total_elems // cols, cols
    # fall back to the natural (N, D) layout (may use masked stores if D<128)
    return total_elems // last_dim, last_dim


def _choose_tile_rows(rows, per_row_bytes, vmem_budget_bytes, sublane):
    """Largest tm (multiple of `sublane`, dividing rows) under the budget."""
    cap = max(sublane, vmem_budget_bytes // max(per_row_bytes, 1))
    if rows <= cap:
        return rows                      # single tile fits comfortably
    cap = (cap // sublane) * sublane
    for tm in range(cap, sublane - 1, -sublane):
        if rows % tm == 0:
            return tm
    # no aligned divisor found: fall back to one tile (correct, unpipelined)
    return rows


def layer_reduce_pallas(layers, reduce_opt="mean",
                        vmem_budget_bytes=8 * 1024 * 1024):
    """Elementwise mean/max over a list of same-shape arrays (layer axis)."""
    num_layers = len(layers)
    shape = layers[0].shape
    in_dtype = layers[0].dtype
    out_dtype = jnp.float32 if reduce_opt == "mean" else in_dtype

    if num_layers == 1:
        return layers[0].astype(out_dtype)

    total = 1
    for d in shape:
        total *= d

    rows, cols = _lane_dense_view(total, shape[-1])

    in_bytes = jnp.dtype(in_dtype).itemsize
    out_bytes = jnp.dtype(out_dtype).itemsize
    # live VMEM per tile row: L input blocks + 1 output block, double-buffered
    per_row_bytes = 2 * cols * (num_layers * in_bytes + out_bytes)
    sublane = max(8, 32 // in_bytes)     # 8 for f32, 16 for bf16, 32 for int8
    tm = _choose_tile_rows(rows, per_row_bytes, vmem_budget_bytes, sublane)
    grid = (rows // tm,)

    # contiguous metadata reshape; no extra HBM copy
    flat_layers = [x.reshape(rows, cols) for x in layers]

    block_spec = pl.BlockSpec((tm, cols), lambda i: (i, 0))

    out = pl.pallas_call(
        _make_reduce_kernel(num_layers, reduce_opt),
        out_shape=jax.ShapeDtypeStruct((rows, cols), out_dtype),
        grid_spec=pltpu.PrefetchScalarGridSpec(
            num_scalar_prefetch=0,
            grid=grid,
            in_specs=[block_spec] * num_layers,
            out_specs=pl.BlockSpec((tm, cols), lambda i: (i, 0)),
        ),
        compiler_params=pltpu.CompilerParams(
            dimension_semantics=("parallel",),
            vmem_limit_bytes=32 * 1024 * 1024,
        ),
        cost_estimate=pl.CostEstimate(
            flops=(num_layers - 1) * total,
            transcendentals=0,
            bytes_accessed=total * (num_layers * in_bytes + out_bytes),
        ),
    )(*flat_layers)
    return out.reshape(shape)


# ------------------------------ LayerSelect --------------------------------

class LayerSelect:
    """JAX/Pallas port of the PyTorch LayerSelect module (forward only)."""

    def __init__(self, word_embedding_dimension, start_layer=-1,
                 end_layer=None, concat_dim=-1, layer_ixs=None,
                 layer_stack=False, reduce_opt="mean"):
        self.word_embedding_dimension = word_embedding_dimension
        self.start_layer = start_layer
        self.end_layer = end_layer
        self.layer_ixs = layer_ixs
        self.concat_dim = concat_dim
        self.layer_stack = layer_stack
        self.reduce_opt = reduce_opt

        if end_layer is not None:
            assert self.end_layer > self.start_layer
            self.select_fn = self.start_end_select
        elif layer_ixs is not None:
            self.select_fn = self.ixs_select
        else:
            self.select_fn = self.start_select

        if self.layer_stack:
            self.reduce_fn = self.stack_reduce
        else:
            self.reduce_fn = functools.partial(jnp.concatenate,
                                               axis=self.concat_dim)

    # --- selection (list slicing glue, identical to torch version) ---
    def start_end_select(self, all_features):
        return all_features[self.start_layer:self.end_layer]

    def start_select(self, all_features):
        return [all_features[self.start_layer]]

    def ixs_select(self, all_features):
        return [all_features[i] for i in self.layer_ixs]

    # --- reduction (hot path in Pallas) ---
    def stack_reduce(self, out_layers):
        if self.reduce_opt in ("mean", "max"):
            return layer_reduce_pallas(out_layers, self.reduce_opt)
        if self.reduce_opt == "median":
            # TODO(synk): median needs a sort along the layer axis; no clean
            # Pallas lowering on TPU, fall back to JAX.  The lower-middle
            # element is taken to match torch.median(dim=0)[0] for even L
            # (jnp.median would interpolate).
            stacked = jnp.stack(out_layers)
            return jnp.sort(stacked, axis=0)[(len(out_layers) - 1) // 2]
        raise ValueError("Invalid reduce_opt at LayerSelect")

    def forward(self, features):
        ft_all_layers = features["all_layer_embeddings"]
        selected_layers = self.select_fn(ft_all_layers)
        features.update({"token_embeddings": self.reduce_fn(selected_layers)})
        return features

    def get_word_embedding_dimension(self):
        return self.word_embedding_dimension


# --------------------------------- main -------------------------------------

if __name__ == "__main__":
    key = jax.random.PRNGKey(0)
    num_layers, B, S, D = 5, 2, 8, 32

    keys = jax.random.split(key, num_layers)
    all_layer_embeddings = [
        jax.random.normal(k, (B, S, D), dtype=jnp.float32) for k in keys
    ]

    # layer_stack + mean over layers 1..4 (compute-heavy path -> Pallas)
    mod_mean = LayerSelect(word_embedding_dimension=D, start_layer=1,
                           end_layer=5, layer_stack=True, reduce_opt="mean")
    out = mod_mean.forward(
        {"all_layer_embeddings": all_layer_embeddings})["token_embeddings"]
    out = jax.block_until_ready(out)
    ref = jnp.mean(jnp.stack(all_layer_embeddings[1:5]).astype(jnp.float32),
                   axis=0)
    assert out.shape == (B, S, D) and out.dtype == jnp.float32
    assert jnp.allclose(out, ref, atol=1e-5, rtol=1e-5)

    # layer_stack + max via explicit layer indices
    mod_max = LayerSelect(word_embedding_dimension=D, layer_ixs=[0, 2, 4],
                          layer_stack=True, reduce_opt="max")
    out_max = jax.block_until_ready(mod_max.forward(
        {"all_layer_embeddings": all_layer_embeddings})["token_embeddings"])
    ref_max = jnp.max(jnp.stack([all_layer_embeddings[i] for i in (0, 2, 4)]),
                      axis=0)
    assert out_max.dtype == jnp.float32
    assert jnp.allclose(out_max, ref_max)

    # bf16 inputs + mean -> float32 output (matches torch .mean(dtype=f32))
    bf16_layers = [x.astype(jnp.bfloat16) for x in all_layer_embeddings]
    mod_mean_bf16 = LayerSelect(word_embedding_dimension=D, start_layer=0,
                                end_layer=5, layer_stack=True,
                                reduce_opt="mean")
    out_bf = jax.block_until_ready(mod_mean_bf16.forward(
        {"all_layer_embeddings": bf16_layers})["token_embeddings"])
    ref_bf = jnp.mean(jnp.stack(bf16_layers).astype(jnp.float32), axis=0)
    assert out_bf.dtype == jnp.float32
    assert jnp.allclose(out_bf, ref_bf, atol=1e-3, rtol=1e-3)

    # median over an even number of layers -> lower-middle (torch semantics)
    mod_med = LayerSelect(word_embedding_dimension=D, layer_ixs=[0, 1, 2, 3],
                          layer_stack=True, reduce_opt="median")
    out_med = jax.block_until_ready(mod_med.forward(
        {"all_layer_embeddings": all_layer_embeddings})["token_embeddings"])
    ref_med = jnp.sort(jnp.stack(all_layer_embeddings[:4]), axis=0)[1]
    assert jnp.allclose(out_med, ref_med)

    # default config: last layer only, concat (glue-only path, plain JAX)
    mod_cat = LayerSelect(word_embedding_dimension=D)
    out_cat = jax.block_until_ready(mod_cat.forward(
        {"all_layer_embeddings": all_layer_embeddings})["token_embeddings"])
    assert jnp.allclose(out_cat, all_layer_embeddings[-1])

    print("KERNEL_OK")
</pallas_src>

<mosaic_0001>
module attributes {stable_mosaic.version = 11 : i64} {
  func.func @kernel(%arg0: i32, %arg1: memref<1x512xf32, #tpu.memory_space<vmem>>, %arg2: memref<1x512xf32, #tpu.memory_space<vmem>>, %arg3: memref<1x512xf32, #tpu.memory_space<vmem>>, %arg4: memref<1x512xf32, #tpu.memory_space<vmem>>, %arg5: memref<1x512xf32, #tpu.memory_space<vmem>>) attributes {dimension_semantics = [#tpu.dimension_semantics<parallel>], iteration_bounds = array<i64: 1>, scalar_prefetch = 0 : i64, scratch_operands = 0 : i64, tpu.core_type = #tpu.core_type<tc>, window_params = [{transform_indices = @transform_0, window_bounds = array<i64: 1, 512>}, {transform_indices = @transform_1, window_bounds = array<i64: 1, 512>}, {transform_indices = @transform_2, window_bounds = array<i64: 1, 512>}, {transform_indices = @transform_3, window_bounds = array<i64: 1, 512>}, {transform_indices = @transform_4, window_bounds = array<i64: 1, 512>}]} {
    %c0 = arith.constant 0 : index
    %c0_0 = arith.constant 0 : index
    %0 = vector.load %arg1[%c0, %c0_0] : memref<1x512xf32, #tpu.memory_space<vmem>>, vector<1x512xf32>
    %c0_1 = arith.constant 0 : index
    %c0_2 = arith.constant 0 : index
    %1 = vector.load %arg2[%c0_1, %c0_2] : memref<1x512xf32, #tpu.memory_space<vmem>>, vector<1x512xf32>
    %2 = arith.addf %0, %1 : vector<1x512xf32>
    %c0_3 = arith.constant 0 : index
    %c0_4 = arith.constant 0 : index
    %3 = vector.load %arg3[%c0_3, %c0_4] : memref<1x512xf32, #tpu.memory_space<vmem>>, vector<1x512xf32>
    %4 = arith.addf %2, %3 : vector<1x512xf32>
    %c0_5 = arith.constant 0 : index
    %c0_6 = arith.constant 0 : index
    %5 = vector.load %arg4[%c0_5, %c0_6] : memref<1x512xf32, #tpu.memory_space<vmem>>, vector<1x512xf32>
    %6 = arith.addf %4, %5 : vector<1x512xf32>
    %cst = arith.constant 2.500000e-01 : f32
    %7 = vector.broadcast %cst : f32 to vector<1x512xf32>
    %8 = arith.mulf %6, %7 : vector<1x512xf32>
    %c0_7 = arith.constant 0 : index
    %c0_8 = arith.constant 0 : index
    %9 = vector.load %arg5[%c0_7, %c0_8] : memref<1x512xf32, #tpu.memory_space<vmem>>, vector<1x512xf32>
    tpu.vector_store %arg5[%c0_7, %c0_8], %8 {strides = array<i32>} : memref<1x512xf32, #tpu.memory_space<vmem>>, vector<1x512xf32>,
    return
  }
  func.func @transform_0(%arg0: i32) -> (i32, i32) {
    %c0_i32 = arith.constant 0 : i32
    %c0_i32_0 = arith.constant 0 : i32
    return %arg0, %c0_i32 : i32, i32
  }
  func.func @transform_1(%arg0: i32) -> (i32, i32) {
    %c0_i32 = arith.constant 0 : i32
    %c0_i32_0 = arith.constant 0 : i32
    return %arg0, %c0_i32 : i32, i32
  }
  func.func @transform_2(%arg0: i32) -> (i32, i32) {
    %c0_i32 = arith.constant 0 : i32
    %c0_i32_0 = arith.constant 0 : i32
    return %arg0, %c0_i32 : i32, i32
  }
  func.func @transform_3(%arg0: i32) -> (i32, i32) {
    %c0_i32 = arith.constant 0 : i32
    %c0_i32_0 = arith.constant 0 : i32
    return %arg0, %c0_i32 : i32, i32
  }
  func.func @transform_4(%arg0: i32) -> (i32, i32) {
    %c0_i32 = arith.constant 0 : i32
    %c0_i32_0 = arith.constant 0 : i32
    return %arg0, %c0_i32 : i32, i32
  }
}

</mosaic_0001>

<bundles_post_ra>
// kernel: tpu_custom_call.1
= control target key start
LH: loop header
LB: loop body
LE: loop exit
PB: predicated region body
PF: predicated region fallthrough
CT: control target
= control target key end

     0   :  { %9 = vsyncpa [#allocation3], 0  ;;  %s216_s0 = inlined_call_operand.hbm [shape: f32[1,512], index: 0, kind: input, shape index: {}]   ;;  %s217_s1 = inlined_call_operand.hbm [shape: f32[1,512], index: 1, kind: input, shape index: {}]   ;;  %s218_s2 = inlined_call_operand.hbm [shape: f32[1,512], index: 2, kind: input, shape index: {}]   ;;  %s219_s3 = inlined_call_operand.vmem [shape: f32[1,512], index: 3, kind: input, shape index: {}]   ;;  %s220_s4 = inlined_call_operand.hbm [shape: f32[1,512], index: 4, kind: output, shape index: {}]  }
   0x1   :  { %10 = vsyncpa [#allocation6], 0 }
   0x2   :  { %11 = vsyncpa [#allocation4], 0  ;;  %s172_s15 = smov [#allocation5]   ;;  %s173_s17 = smov [#allocation2]  }
   0x3   :  { %s28_s16 = sshll.u32 %s172_s15, 4  ;;  %s18_s18 = sshll.u32 %s173_s17, 4  ;;  %s29_s16 = int_to_ptr.vmem [resolvable:$true] %s28_s16  ;;  %s19_s18 = int_to_ptr.vmem [resolvable:$true] %s18_s18 }
   0x4   :  { %s94_s19 = scalar_lea.vmem %s29_s16, 64  ;;  %p99_p1 = scmp.lt.s32.totalorder %s29_s16, %s29_s16 }
   0x5   :  { %p95_p0 = scmp.ne.s32.totalorder %s29_s16, %s94_s19  ;;  %p100_p2 = scmp.lt.s32.totalorder %s94_s19, %s94_s19 }
   0x7   :  { %p101_p3 = por %p100_p2, %p99_p1 }
   0x9   :  { %p102_p4 = pnand %p101_p3, %p95_p0 }
   0xb   :  { %105 = shalt.err (!%p102_p4)
}
   0xc   :  { %31 = dma.hbm_to_vmem [thread:$0]  %s217_s1, 64, %s29_s16, [#allocation6]  }
   0xd   :  { %s114_s22 = scalar_lea.vmem %s19_s18, 64  ;;  %p119_p6 = scmp.lt.s32.totalorder %s19_s18, %s19_s18 }
   0xe   :  { %p115_p5 = scmp.ne.s32.totalorder %s19_s18, %s114_s22  ;;  %p120_p7 = scmp.lt.s32.totalorder %s114_s22, %s114_s22 }
  0x10   :  { %p121_p8 = por %p120_p7, %p119_p6 }
  0x12   :  { %p122_p9 = pnand %p121_p8, %p115_p5 }
  0x14   :  { %125 = shalt.err (!%p122_p9)
}
  0x15   :  { %21 = dma.hbm_to_vmem [thread:$0]  %s216_s0, 64, %s19_s18, [#allocation3]  }
  0x16   :  { %s174_s25 = smov [#allocation7]  }
  0x17   :  { %s38_s26 = sshll.u32 %s174_s25, 4  ;;  %s39_s26 = int_to_ptr.vmem [resolvable:$true] %s38_s26 }
  0x18   :  { %s134_s27 = scalar_lea.vmem %s39_s26, 64  ;;  %p139_p11 = scmp.lt.s32.totalorder %s39_s26, %s39_s26 }
  0x19   :  { %p135_p10 = scmp.ne.s32.totalorder %s39_s26, %s134_s27  ;;  %p140_p12 = scmp.lt.s32.totalorder %s134_s27, %s134_s27 }
  0x1b   :  { %p141_p13 = por %p140_p12, %p139_p11 }
  0x1d   :  { %p142_p0 = pnand %p141_p13, %p135_p10 }
  0x1f   :  { %145 = shalt.err (!%p142_p0)
}
  0x20   :  { %41 = dma.hbm_to_vmem [thread:$0]  %s218_s2, 64, %s39_s26, [#allocation6]  }
  0x21   :  { %166 = dma.done.wait [#allocation3], 64  }
  0x22   :  { %167 = vsyncadd [#allocation3], 4294967232 }
  0x23   :  { %168 = dma.done.wait [#allocation6], 128  }
  0x24   :  { %169 = vsyncadd [#allocation6], 4294967168  ;;  %v53_v0 = vld [vmem:[#allocation2] sm:$0xf]  ;;  %v54_v1 = vld [vmem:[#allocation5] sm:$0xf]  ;;  %v61_v5 = vlaneseq }
  0x25   :  { %v56_v2 = vld [vmem:[#allocation7] sm:$0xf]  ;;  %v55_v3 = vadd.f32 %v54_v1, %v53_v0  ;;  %v58_v4 = vld [vmem:[%s219_s3] sm:$0xf]  ;;  %s175_s30 = smov [#allocation8]  }
  0x26   :  { %s72_s5 = sshll.u32 %s175_s30, 4  ;;  %vm63_vm0 = vcmp.lt.s32.totalorder %v61_v5, 512  ;;  %s73_s5 = int_to_ptr.vmem [resolvable:$true] %s72_s5 }
  0x27   :  { %v57_v6 = vadd.f32 %v56_v2, %v55_v3  ;;  %s146_s2 = scalar_lea.vmem %s73_s5, 64  ;;  %p151_p2 = scmp.lt.s32.totalorder %s73_s5, %s73_s5 }
  0x28   :  { %p147_p1 = scmp.ne.s32.totalorder %s73_s5, %s146_s2  ;;  %p152_p3 = scmp.lt.s32.totalorder %s146_s2, %s146_s2 }
  0x29   :  { %v59_v7 = vadd.f32 %v58_v4, %v57_v6 }
  0x2a   :  { %p153_p4 = por %p152_p3, %p151_p2 }
  0x2b   :  { %v60_v8 = vmul.f32 0.25, %v59_v7 }
  0x2c   :  { %p154_p5 = pnand %p153_p4, %p147_p1 }
  0x2d   :  { %65 = vst.msk [vmem:[#allocation8] sm:$0xf] %vm63_vm0, %v60_v8 }
  0x2e   :  { %157 = shalt.err (!%p154_p5)
}
  0x2f   :  { %75 = dma.vmem_to_hbm [thread:$0]  %s73_s5, 64, %s220_s4, [#allocation4]  }
  0x30   :  { %170 = dma.done.wait [#allocation4], 64  }
  0x31   :  { %171 = vsyncadd [#allocation4], 4294967232 }
  0x32   :  { %79 = vsyncpa [#allocation3], 1 }
  0x33   :  { %80 = vsyncpa [#allocation6], 1 }
  0x34   :  { %81 = vsyncpa [#allocation4], 1 }

</bundles_post_ra>
